<compile_context>
chip_gen: v7x
topology: tpu7x:2x2x1
jax: 0.10.0
libtpu: 0.0.40
codegen_flags: <defaults>
</compile_context>

<pallas_src>
import math

import jax
import jax.numpy as jnp
from jax.experimental import pallas as pl
from jax.experimental.pallas import tpu as pltpu


# ----------------------------------------------------------------------------
# Deterministic parameter construction (the "weights" of GammaBandPassFilter).
# Pure Python floats so they become compile-time constants in the kernel.
# ----------------------------------------------------------------------------
def _gamma_kernel(order: int, tau: float, length: int):
    """Normalized discrete gamma impulse response Gamma_n(t)."""
    k = [
        ((order * t / tau) ** order)
        * math.exp(-order * t / tau)
        / (math.factorial(order - 1) * tau)
        for t in range(length)
    ]
    s = sum(k)
    return [v / s for v in k]


def make_bandpass_weights(length: int):
    """gamma1 - gamma2 band-pass taps (GammaDelay(2,3) - GammaDelay(3,6))."""
    k1 = _gamma_kernel(2, 3.0, length)
    k2 = _gamma_kernel(3, 6.0, length)
    return [a - b for a, b in zip(k1, k2)]


# ----------------------------------------------------------------------------
# Pallas kernel: out[r, l] = sum_t taps[t] * x[t, r, l]
# Taps are closure-captured compile-time constants; reduction is a pairwise
# add tree over the unrolled (small, static) T taps.
# ----------------------------------------------------------------------------
def _make_lamina_kernel(taps):
    taps = tuple(float(w) for w in taps)

    def kernel(x_ref, o_ref):
        # x_ref: (T, tile_r, L) f32 VMEM; o_ref: (tile_r, L) f32 VMEM.
        terms = [taps[t] * x_ref[t] for t in range(len(taps))]
        # Pairwise combine to shorten the serial VALU dependency chain.
        while len(terms) > 1:
            nxt = [terms[i] + terms[i + 1] for i in range(0, len(terms) - 1, 2)]
            if len(terms) % 2:
                nxt.append(terms[-1])
            terms = nxt
        o_ref[...] = terms[0]

    return kernel


def _round_up(x: int, m: int) -> int:
    return (x + m - 1) // m * m


def _choose_lane_width(n: int) -> int:
    """Largest multiple of 128 (<= 2048) that divides n, else a padded default."""
    for cand in (2048, 1024, 512, 256, 128):
        if n % cand == 0:
            return cand
    # No exact divisor: fall back to a wide lane dim and pad the tail.
    return 1024 if n >= 1024 else 128


# ----------------------------------------------------------------------------
# Wrapper: reshape (T, H, W) -> lane-dense (T, R, L), tile over rows, reduce,
# reshape back to (H, W).
# ----------------------------------------------------------------------------
def lamina_forward(lamina_ipt: jnp.ndarray,
                   taps,
                   max_block_bytes: int = 8 * 1024 * 1024) -> jnp.ndarray:
    """Apply the Lamina gamma band-pass filter to a (T, H, W) frame history."""
    T, H, W = lamina_ipt.shape
    assert len(taps) == T
    N = H * W

    # Lane-dense layout: wide last dim (multiple of 128), exact divisor of N
    # when possible so the wrapper never materializes a padded HBM copy.
    L = _choose_lane_width(N)
    N_pad = _round_up(N, L)
    R = N_pad // L

    # Row tiling: biggest block under budget, multiple of 8 rows, and try to
    # keep >= 2 grid steps so v7x can shard across its 2 TensorCores.
    if R <= 8:
        tile_r = R                      # full-extent block (allowed by Pallas)
        R_pad = R
    else:
        budget_rows = max(8, (max_block_bytes // (T * L * 4)) // 8 * 8)
        half_rows = _round_up(pl.cdiv(R, 2), 8)
        tile_r = min(budget_rows, half_rows)
        R_pad = _round_up(R, tile_r)
    grid_r = R_pad // tile_r

    # Flatten the spatial plane; pad only if strictly required.
    x_flat = lamina_ipt.reshape(T, N)
    if R_pad * L != N:
        x_flat = jnp.pad(x_flat, ((0, 0), (0, R_pad * L - N)))
    x_slab = x_flat.reshape(T, R_pad, L)

    # Explicit VMEM budget: double-buffered input + double-buffered output.
    in_block = T * tile_r * L * 4
    out_block = tile_r * L * 4
    vmem_limit = min(max(2 * (in_block + out_block) + (2 << 20), 16 << 20),
                     56 << 20)  # keep headroom under v7x's 64 MiB VMEM

    # Advisory cost hint for XLA's scheduler around the custom call.
    cost = pl.CostEstimate(
        flops=2 * T * R_pad * L,
        transcendentals=0,
        bytes_accessed=(T + 1) * R_pad * L * 4,
    )

    out_slab = pl.pallas_call(
        _make_lamina_kernel(taps),
        out_shape=jax.ShapeDtypeStruct((R_pad, L), lamina_ipt.dtype),
        grid=(grid_r,),
        in_specs=[
            pl.BlockSpec((T, tile_r, L), lambda i: (0, i, 0)),
        ],
        out_specs=pl.BlockSpec((tile_r, L), lambda i: (i, 0)),
        compiler_params=pltpu.CompilerParams(
            dimension_semantics=("parallel",),
            vmem_limit_bytes=vmem_limit),
        cost_estimate=cost,
    )(x_slab)

    return out_slab.reshape(R_pad * L)[:N].reshape(H, W)


# ----------------------------------------------------------------------------
# Demo / self-check
# ----------------------------------------------------------------------------
if __name__ == "__main__":
    key = jax.random.PRNGKey(0)
    T, H, W = 8, 16, 128  # small temporal history, lane-aligned spatial plane
    lamina_ipt = jax.random.uniform(key, (T, H, W), dtype=jnp.float32)

    taps = make_bandpass_weights(T)

    out = lamina_forward(lamina_ipt, taps)
    out = jax.block_until_ready(out)

    # Pure-JAX reference for the same semantics.
    w = jnp.asarray(taps, dtype=jnp.float32)
    ref = jnp.einsum("t,thw->hw", w, lamina_ipt)
    assert out.shape == (H, W)
    assert jnp.allclose(out, ref, atol=1e-5, rtol=1e-5)

    print("KERNEL_OK")
</pallas_src>

<mosaic_0001>
module attributes {stable_mosaic.version = 11 : i64} {
  func.func @kernel(%arg0: i32, %arg1: memref<8x1x2048xf32, #tpu.memory_space<vmem>>, %arg2: memref<1x2048xf32, #tpu.memory_space<vmem>>) attributes {dimension_semantics = [#tpu.dimension_semantics<parallel>], iteration_bounds = array<i64: 1>, scalar_prefetch = 0 : i64, scratch_operands = 0 : i64, tpu.core_type = #tpu.core_type<tc>, window_params = [{transform_indices = @transform_0, window_bounds = array<i64: 8, 1, 2048>}, {transform_indices = @transform_1, window_bounds = array<i64: 1, 2048>}]} {
    %c0 = arith.constant 0 : index
    %c0_0 = arith.constant 0 : index
    %c0_1 = arith.constant 0 : index
    %0 = vector.load %arg1[%c0, %c0_0, %c0_1] : memref<8x1x2048xf32, #tpu.memory_space<vmem>>, vector<1x1x2048xf32>
    %1 = vector.shape_cast %0 : vector<1x1x2048xf32> to vector<1x2048xf32>
    %cst = arith.constant 0.000000e+00 : f32
    %2 = vector.broadcast %cst : f32 to vector<1x2048xf32>
    %3 = arith.mulf %2, %1 : vector<1x2048xf32>
    %c1 = arith.constant 1 : index
    %c0_2 = arith.constant 0 : index
    %c0_3 = arith.constant 0 : index
    %4 = vector.load %arg1[%c1, %c0_2, %c0_3] : memref<8x1x2048xf32, #tpu.memory_space<vmem>>, vector<1x1x2048xf32>
    %5 = vector.shape_cast %4 : vector<1x1x2048xf32> to vector<1x2048xf32>
    %cst_4 = arith.constant 0.0746527836 : f32
    %6 = vector.broadcast %cst_4 : f32 to vector<1x2048xf32>
    %7 = arith.mulf %6, %5 : vector<1x2048xf32>
    %c2 = arith.constant 2 : index
    %c0_5 = arith.constant 0 : index
    %c0_6 = arith.constant 0 : index
    %8 = vector.load %arg1[%c2, %c0_5, %c0_6] : memref<8x1x2048xf32, #tpu.memory_space<vmem>>, vector<1x1x2048xf32>
    %9 = vector.shape_cast %8 : vector<1x1x2048xf32> to vector<1x2048xf32>
    %cst_7 = arith.constant 0.119095273 : f32
    %10 = vector.broadcast %cst_7 : f32 to vector<1x2048xf32>
    %11 = arith.mulf %10, %9 : vector<1x2048xf32>
    %c3 = arith.constant 3 : index
    %c0_8 = arith.constant 0 : index
    %c0_9 = arith.constant 0 : index
    %12 = vector.load %arg1[%c3, %c0_8, %c0_9] : memref<8x1x2048xf32, #tpu.memory_space<vmem>>, vector<1x1x2048xf32>
    %13 = vector.shape_cast %12 : vector<1x1x2048xf32> to vector<1x2048xf32>
    %cst_10 = arith.constant 0.084667474 : f32
    %14 = vector.broadcast %cst_10 : f32 to vector<1x2048xf32>
    %15 = arith.mulf %14, %13 : vector<1x2048xf32>
    %c4 = arith.constant 4 : index
    %c0_11 = arith.constant 0 : index
    %c0_12 = arith.constant 0 : index
    %16 = vector.load %arg1[%c4, %c0_11, %c0_12] : memref<8x1x2048xf32, #tpu.memory_space<vmem>>, vector<1x1x2048xf32>
    %17 = vector.shape_cast %16 : vector<1x1x2048xf32> to vector<1x2048xf32>
    %cst_13 = arith.constant 0.0135268643 : f32
    %18 = vector.broadcast %cst_13 : f32 to vector<1x2048xf32>
    %19 = arith.mulf %18, %17 : vector<1x2048xf32>
    %c5 = arith.constant 5 : index
    %c0_14 = arith.constant 0 : index
    %c0_15 = arith.constant 0 : index
    %20 = vector.load %arg1[%c5, %c0_14, %c0_15] : memref<8x1x2048xf32, #tpu.memory_space<vmem>>, vector<1x1x2048xf32>
    %21 = vector.shape_cast %20 : vector<1x1x2048xf32> to vector<1x2048xf32>
    %cst_16 = arith.constant -0.055917792 : f32
    %22 = vector.broadcast %cst_16 : f32 to vector<1x2048xf32>
    %23 = arith.mulf %22, %21 : vector<1x2048xf32>
    %c6 = arith.constant 6 : index
    %c0_17 = arith.constant 0 : index
    %c0_18 = arith.constant 0 : index
    %24 = vector.load %arg1[%c6, %c0_17, %c0_18] : memref<8x1x2048xf32, #tpu.memory_space<vmem>>, vector<1x1x2048xf32>
    %25 = vector.shape_cast %24 : vector<1x1x2048xf32> to vector<1x2048xf32>
    %cst_19 = arith.constant -0.105204329 : f32
    %26 = vector.broadcast %cst_19 : f32 to vector<1x2048xf32>
    %27 = arith.mulf %26, %25 : vector<1x2048xf32>
    %c7 = arith.constant 7 : index
    %c0_20 = arith.constant 0 : index
    %c0_21 = arith.constant 0 : index
    %28 = vector.load %arg1[%c7, %c0_20, %c0_21] : memref<8x1x2048xf32, #tpu.memory_space<vmem>>, vector<1x1x2048xf32>
    %29 = vector.shape_cast %28 : vector<1x1x2048xf32> to vector<1x2048xf32>
    %cst_22 = arith.constant -0.130820274 : f32
    %30 = vector.broadcast %cst_22 : f32 to vector<1x2048xf32>
    %31 = arith.mulf %30, %29 : vector<1x2048xf32>
    %32 = arith.addf %3, %7 : vector<1x2048xf32>
    %33 = arith.addf %11, %15 : vector<1x2048xf32>
    %34 = arith.addf %19, %23 : vector<1x2048xf32>
    %35 = arith.addf %27, %31 : vector<1x2048xf32>
    %36 = arith.addf %32, %33 : vector<1x2048xf32>
    %37 = arith.addf %34, %35 : vector<1x2048xf32>
    %38 = arith.addf %36, %37 : vector<1x2048xf32>
    %c0_23 = arith.constant 0 : index
    %c0_24 = arith.constant 0 : index
    %39 = vector.load %arg2[%c0_23, %c0_24] : memref<1x2048xf32, #tpu.memory_space<vmem>>, vector<1x2048xf32>
    tpu.vector_store %arg2[%c0_23, %c0_24], %38 {strides = array<i32>} : memref<1x2048xf32, #tpu.memory_space<vmem>>, vector<1x2048xf32>,
    return
  }
  func.func @transform_0(%arg0: i32) -> (i32, i32, i32) {
    %c0_i32 = arith.constant 0 : i32
    %c0_i32_0 = arith.constant 0 : i32
    %c0_i32_1 = arith.constant 0 : i32
    return %c0_i32, %arg0, %c0_i32_0 : i32, i32, i32
  }
  func.func @transform_1(%arg0: i32) -> (i32, i32) {
    %c0_i32 = arith.constant 0 : i32
    %c0_i32_0 = arith.constant 0 : i32
    return %arg0, %c0_i32 : i32, i32
  }
}

</mosaic_0001>

<bundles_post_ra>
// kernel: tpu_custom_call.1
= control target key start
LH: loop header
LB: loop body
LE: loop exit
PB: predicated region body
PF: predicated region fallthrough
CT: control target
= control target key end

     0   :  { %6 = vsyncpa [#allocation3], 0  ;;  %s183_s0 = inlined_call_operand.hbm [shape: f32[8,1,2048], index: 0, kind: input, shape index: {}]   ;;  %s184_s1 = inlined_call_operand.hbm [shape: f32[1,2048], index: 1, kind: output, shape index: {}]  }
   0x1   :  { %7 = vsyncpa [#allocation4], 0  ;;  %s145_s6 = smov [#allocation2]   ;;  %s97_s10 = scalar_lea.hbm %s183_s0, 2048 }
   0x2   :  { %s13_s7 = sshll.u32 %s145_s6, 4  ;;  %p98_p0 = scmp.ne.s32.totalorder %s183_s0, %s97_s10  ;;  %s14_s7 = int_to_ptr.vmem [resolvable:$true] %s13_s7 }
   0x3   :  { %p101_p1 = scmp.lt.u32.totalorder %s97_s10, %s183_s0 }
   0x5   :  { %p103_p2 = pnand %p101_p1, %p98_p0 }
   0x7   :  { %106 = shalt.err (!%p103_p2)
}
   0x8   :  { %s107_s15 = scalar_lea.vmem %s14_s7, 2048  ;;  %p112_p4 = scmp.lt.s32.totalorder %s14_s7, %s14_s7 }
   0x9   :  { %p108_p3 = scmp.ne.s32.totalorder %s14_s7, %s107_s15  ;;  %p113_p5 = scmp.lt.s32.totalorder %s107_s15, %s107_s15 }
   0xb   :  { %p114_p6 = por %p113_p5, %p112_p4 }
   0xd   :  { %p115_p7 = pnand %p114_p6, %p108_p3 }
   0xf   :  { %118 = shalt.err (!%p115_p7)
}
  0x10   :  { %s146_s16 = smov 256   ;;  %s147_s17 = smov 16  }
  0x11   :  { %19 = dma.hbm_to_vmem [thread:$0]  %s183_s0, 2048, %s14_s7, [#allocation3], %s146_s16, %s146_s16, %s147_s17  }
  0x12   :  { %141 = dma.done.wait [#allocation3], 2048  }
  0x13   :  { %142 = vsyncadd [#allocation3], 4294965248  ;;  %v23_v0 = vld [vmem:[#allocation2] sm:$0xff]  ;;  %v28_v1 = vld [vmem:[#allocation2 + $0x10] sm:$0xff]  ;;  %s148_s0 = smov [#allocation5]  }
  0x14   :  { %v33_v2 = vld [vmem:[#allocation2 + $0x20] sm:$0xff]  ;;  %v25_v3 = vmul.f32 0.0, %v23_v0  ;;  %v30_v4 = vmul.f32 0.07465278, %v28_v1  ;;  %v38_v6 = vld [vmem:[#allocation2 + $0x30] sm:$0xff]  ;;  %v24_v17 = vld [vmem:[#allocation2 + $0x8] sm:$0xff] }
  0x15   :  { %v35_v5 = vmul.f32 0.11909527, %v33_v2  ;;  %v40_v7 = vmul.f32 0.084667474, %v38_v6  ;;  %v43_v8 = vld [vmem:[#allocation2 + $0x40] sm:$0xff]  ;;  %v48_v9 = vld [vmem:[#allocation2 + $0x50] sm:$0xff] }
  0x16   :  { %v53_v10 = vld [vmem:[#allocation2 + $0x60] sm:$0xff]  ;;  %v45_v11 = vmul.f32 0.013526864, %v43_v8  ;;  %v50_v12 = vmul.f32 -0.055917792, %v48_v9  ;;  %v62_v14 = vadd.f32 %v30_v4, %v25_v3  ;;  %v58_v15 = vld [vmem:[#allocation2 + $0x70] sm:$0xff] }
  0x17   :  { %v55_v13 = vmul.f32 -0.10520433, %v53_v10  ;;  %v64_v16 = vadd.f32 %v40_v7, %v35_v5  ;;  %v29_v18 = vld [vmem:[#allocation2 + $0x18] sm:$0xff]  ;;  %v60_v19 = vmul.f32 -0.13082027, %v58_v15  ;;  %v26_v21 = vmul.f32 0.0, %v24_v17 }
  0x18   :  { %v66_v20 = vadd.f32 %v50_v12, %v45_v11  ;;  %v31_v22 = vmul.f32 0.07465278, %v29_v18  ;;  %v34_v23 = vld [vmem:[#allocation2 + $0x28] sm:$0xff]  ;;  %v39_v26 = vld [vmem:[#allocation2 + $0x38] sm:$0xff]  ;;  %s84_s20 = sshll.u32 %s148_s0, 4  ;;  %s85_s20 = int_to_ptr.vmem [resolvable:$true] %s84_s20 }
  0x19   :  { %v70_v24 = vadd.f32 %v64_v16, %v62_v14  ;;  %v36_v25 = vmul.f32 0.11909527, %v34_v23  ;;  %v44_v27 = vld [vmem:[#allocation2 + $0x48] sm:$0xff]  ;;  %v49_v28 = vld [vmem:[#allocation2 + $0x58] sm:$0xff]  ;;  %v68_v29 = vadd.f32 %v60_v19, %v55_v13  ;;  %v41_v30 = vmul.f32 0.084667474, %v39_v26  ;;  %p124_p9 = scmp.lt.s32.totalorder %s85_s20, %s85_s20 }
  0x1a   :  { %v46_v31 = vmul.f32 0.013526864, %v44_v27  ;;  %v51_v32 = vmul.f32 -0.055917792, %v49_v28  ;;  %v54_v33 = vld [vmem:[#allocation2 + $0x68] sm:$0xff]  ;;  %v59_v34 = vld [vmem:[#allocation2 + $0x78] sm:$0xff]  ;;  %v63_v35 = vadd.f32 %v31_v22, %v26_v21 }
  0x1b   :  { %v72_v36 = vadd.f32 %v68_v29, %v66_v20  ;;  %v56_v37 = vmul.f32 -0.10520433, %v54_v33  ;;  %v61_v38 = vmul.f32 -0.13082027, %v59_v34  ;;  %v65_v39 = vadd.f32 %v41_v30, %v36_v25  ;;  %s119_s21 = scalar_lea.vmem %s85_s20, 256 }
  0x1c   :  { %v67_v40 = vadd.f32 %v51_v32, %v46_v31  ;;  %p120_p8 = scmp.ne.s32.totalorder %s85_s20, %s119_s21  ;;  %p125_p10 = scmp.lt.s32.totalorder %s119_s21, %s119_s21 }
  0x1d   :  { %v74_v41 = vadd.f32 %v72_v36, %v70_v24  ;;  %v69_v42 = vadd.f32 %v61_v38, %v56_v37  ;;  %v71_v43 = vadd.f32 %v65_v39, %v63_v35 }
  0x1e   :  { %p126_p11 = por %p125_p10, %p124_p9 }
  0x1f   :  { %76 = vst [vmem:[#allocation5] sm:$0xff] %v74_v41  ;;  %v73_v44 = vadd.f32 %v69_v42, %v67_v40 }
  0x20   :  { %p127_p12 = pnand %p126_p11, %p120_p8 }
  0x21   :  { %v75_v45 = vadd.f32 %v73_v44, %v71_v43 }
  0x23   :  { %77 = vst [vmem:[#allocation5 + $0x8] sm:$0xff] %v75_v45 }
  0x24   :  { %130 = shalt.err (!%p127_p12)
}
  0x25   :  { %s131_s24 = scalar_lea.hbm %s184_s1, 256 }
  0x26   :  { %p132_p13 = scmp.ne.s32.totalorder %s184_s1, %s131_s24  ;;  %p135_p0 = scmp.lt.u32.totalorder %s131_s24, %s184_s1 }
  0x28   :  { %p137_p1 = pnand %p135_p0, %p132_p13 }
  0x2a   :  { %140 = shalt.err (!%p137_p1)
}
  0x2b   :  { %87 = dma.vmem_to_hbm [thread:$0]  %s85_s20, 256, %s184_s1, [#allocation4]  }
  0x2c   :  { %143 = dma.done.wait [#allocation4], 256  }
  0x2d   :  { %144 = vsyncadd [#allocation4], 4294967040 }
  0x2e   :  { %91 = vsyncpa [#allocation3], 1 }
  0x2f   :  { %92 = vsyncpa [#allocation4], 1 }

</bundles_post_ra>
